<compile_context>
chip_gen: v6e
topology: v6e:2x2x1
jax: 0.10.0
libtpu: 0.0.40
codegen_flags: <defaults>
</compile_context>

<pallas_src>
import jax
import jax.numpy as jnp
from jax.experimental import pallas as pl
from jax.experimental.pallas import tpu as pltpu

_LANE = 128


def _round_up(x, m):
    return (x + m - 1) // m * m


def _cdiv(a, b):
    return (a + b - 1) // b


def _choose_batch_tiling(B, block_b, align):
    """Pick (TB, B_p, n_tiles) with minimal padding and >=2 tiles when possible."""
    n_tiles = _cdiv(B, block_b)
    # Give v7x's second TensorCore work (and let DMAs pipeline) when the batch
    # is large enough for two tiles; no-op for tiny batches.
    if n_tiles == 1 and B >= 2 * align:
        n_tiles = 2
    TB = _round_up(_cdiv(B, n_tiles), align)
    B_p = TB * n_tiles
    return TB, B_p, n_tiles


def actor_kernel(x_ref, w1_ref, b1_ref, w2_ref, b2_ref, out_ref):
    # linear_in: x @ W1 + b1, then ReLU (f32 accumulation on the MXU).
    h = jnp.dot(x_ref[...], w1_ref[...], preferred_element_type=jnp.float32)
    h = jnp.maximum(h + b1_ref[...], 0.0)          # b1 is (1, H_p) -> broadcasts

    # action_head: h @ W2 + b2 (padded action columns carry a -1e30 bias).
    # h is cast to the weight dtype so the bf16 path stays on the fast MXU.
    logits = jnp.dot(h.astype(w2_ref.dtype), w2_ref[...],
                     preferred_element_type=jnp.float32)
    logits = logits + b2_ref[...]

    # Softmax over the action axis; padded columns underflow to exactly 0.
    m = jnp.max(logits, axis=1, keepdims=True)
    e = jnp.exp(logits - m)
    denom = jnp.sum(e, axis=1, keepdims=True)
    # Exact reciprocal (VALU); approx=True would violate the 1e-5 tolerance.
    out_ref[...] = (e * pl.reciprocal(denom, approx=False)).astype(out_ref.dtype)


def prepare_actor_params(w1, b1, w2, b2, *, param_dtype=jnp.float32):
    """One-time padding/packing of the constant parameters (hoisted out of the
    per-call path).  w1: [S, H], b1: [1, H], w2: [H, A], b2: [1, A]."""
    S, H = w1.shape
    A = w2.shape[1]
    H_p = _round_up(H, _LANE)
    A_p = _round_up(A, _LANE)

    w1_p = jnp.zeros((S, H_p), param_dtype).at[:, :H].set(w1.astype(param_dtype))
    b1_p = jnp.zeros((1, H_p), jnp.float32).at[:, :H].set(b1.reshape(1, H))
    w2_p = jnp.zeros((H_p, A_p), param_dtype).at[:H, :A].set(w2.astype(param_dtype))
    # Padded action columns get a -1e30 bias so exp(logit - max) == 0 exactly
    # and the softmax over A_p equals the softmax over the real A.
    # (Assumes real logits never approach -1e30, which holds for any sane net.)
    b2_p = jnp.full((1, A_p), -1e30, jnp.float32).at[:, :A].set(b2.reshape(1, A))
    return (w1_p, b1_p, w2_p, b2_p)


def actor_forward(x, params, action_space, *, block_b=1024):
    """x: [B, S] f32; params: output of prepare_actor_params (already padded)."""
    w1_p, b1_p, w2_p, b2_p = params
    B, S = x.shape
    assert w1_p.shape[0] == S, "state_space mismatch between x and params"
    H_p = w1_p.shape[1]
    A_p = w2_p.shape[1]

    # Activations follow the weight dtype (f32 or bf16); bf16 needs 16-row
    # sublane packing, f32 needs 8.
    x_dtype = w1_p.dtype
    align = 16 if x_dtype == jnp.bfloat16 else 8
    TB, B_p, n_tiles = _choose_batch_tiling(B, block_b, align)

    # Only the batch dim is padded; the feature dim stays at its native S.
    x_p = jnp.zeros((B_p, S), x_dtype).at[:B, :].set(x.astype(x_dtype))

    isz = jnp.dtype(x_dtype).itemsize
    cost = pl.CostEstimate(
        flops=2 * B_p * (S * H_p + H_p * A_p),
        transcendentals=B_p * A_p,
        bytes_accessed=(isz * (B_p * S + S * H_p + H_p * A_p)
                        + 4 * (H_p + A_p + B_p * A_p)),
    )

    out_p = pl.pallas_call(
        actor_kernel,
        out_shape=jax.ShapeDtypeStruct((B_p, A_p), jnp.float32),
        grid=(n_tiles,),
        in_specs=[
            # x: tiled over batch; last dim == full array dim (legal BlockSpec).
            pl.BlockSpec((TB, S), lambda i: (i, 0)),
            # Weights/biases: constant index_map -> DMA'd once, VMEM-resident.
            pl.BlockSpec((S, H_p), lambda i: (0, 0)),
            pl.BlockSpec((1, H_p), lambda i: (0, 0)),
            pl.BlockSpec((H_p, A_p), lambda i: (0, 0)),
            pl.BlockSpec((1, A_p), lambda i: (0, 0)),
        ],
        out_specs=pl.BlockSpec((TB, A_p), lambda i: (i, 0)),
        compiler_params=pltpu.CompilerParams(
            dimension_semantics=("parallel",)),
        cost_estimate=cost,
    )(x_p, w1_p, b1_p, w2_p, b2_p)

    return out_p[:B, :action_space]


def init_actor_params(key, state_space, action_space, hidden_size=64):
    # Mimic nn.Linear's default init: U(-1/sqrt(fan_in), 1/sqrt(fan_in)).
    k1, k2, k3, k4 = jax.random.split(key, 4)
    bound1 = 1.0 / jnp.sqrt(jnp.float32(state_space))
    bound2 = 1.0 / jnp.sqrt(jnp.float32(hidden_size))
    # Stored as [in, out] (transpose of PyTorch's [out, in]) for x @ W.
    w1 = jax.random.uniform(k1, (state_space, hidden_size), jnp.float32, -bound1, bound1)
    b1 = jax.random.uniform(k2, (1, hidden_size), jnp.float32, -bound1, bound1)
    w2 = jax.random.uniform(k3, (hidden_size, action_space), jnp.float32, -bound2, bound2)
    b2 = jax.random.uniform(k4, (1, action_space), jnp.float32, -bound2, bound2)
    return w1, b1, w2, b2


def actor_reference(x, w1, b1, w2, b2):
    h = jnp.maximum(x @ w1 + b1, 0.0)
    logits = h @ w2 + b2
    return jax.nn.softmax(logits, axis=1)


if __name__ == "__main__":
    batch = 8
    state_space = 16
    action_space = 4
    hidden_size = 64

    key = jax.random.PRNGKey(0)
    kx, kp = jax.random.split(key)
    x = jax.random.normal(kx, (batch, state_space), jnp.float32)
    w1, b1, w2, b2 = init_actor_params(kp, state_space, action_space, hidden_size)

    # Constant-parameter padding is done exactly once (hoisted out of the call).
    params_f32 = prepare_actor_params(w1, b1, w2, b2)

    out = jax.block_until_ready(actor_forward(x, params_f32, action_space))
    ref = actor_reference(x, w1, b1, w2, b2)
    assert out.shape == (batch, action_space)
    assert jnp.allclose(out, ref, atol=1e-5, rtol=1e-5)
    assert jnp.allclose(jnp.sum(out, axis=1), jnp.ones((batch,)), atol=1e-5)

    # Multi-tile grid path: B=300 now tiles as 2 x 152 (pads 4 rows, not 212).
    xb = jax.random.normal(kx, (300, state_space), jnp.float32)
    outb = jax.block_until_ready(actor_forward(xb, params_f32, action_space))
    refb = actor_reference(xb, w1, b1, w2, b2)
    assert outb.shape == (300, action_space)
    assert jnp.allclose(outb, refb, atol=1e-5, rtol=1e-5)

    # Optional bf16 parameter/activation path (v6e/v7x: half the DMA bytes,
    # 2x MXU rate) -- f32 accumulation keeps the error small but above 1e-5,
    # so it is checked at a looser tolerance here.
    params_bf16 = prepare_actor_params(w1, b1, w2, b2, param_dtype=jnp.bfloat16)
    outbf = jax.block_until_ready(actor_forward(xb, params_bf16, action_space))
    assert outbf.shape == (300, action_space)
    assert jnp.allclose(outbf, refb, atol=2e-2, rtol=2e-2)
    assert jnp.allclose(jnp.sum(outbf, axis=1), jnp.ones((300,)), atol=1e-3)

    print("KERNEL_OK")
</pallas_src>

<mosaic_0001>
module attributes {stable_mosaic.version = 11 : i64} {
  func.func @actor_kernel(%arg0: i32, %arg1: memref<8x16xf32, #tpu.memory_space<vmem>>, %arg2: memref<16x128xf32, #tpu.memory_space<vmem>>, %arg3: memref<1x128xf32, #tpu.memory_space<vmem>>, %arg4: memref<128x128xf32, #tpu.memory_space<vmem>>, %arg5: memref<1x128xf32, #tpu.memory_space<vmem>>, %arg6: memref<8x128xf32, #tpu.memory_space<vmem>>) attributes {dimension_semantics = [#tpu.dimension_semantics<parallel>], iteration_bounds = array<i64: 1>, scalar_prefetch = 0 : i64, scratch_operands = 0 : i64, tpu.core_type = #tpu.core_type<tc>, window_params = [{transform_indices = @transform_0, window_bounds = array<i64: 8, 16>}, {pipeline_mode = #tpu.pipeline_mode<synchronous>, transform_indices = @transform_1, window_bounds = array<i64: 16, 128>}, {pipeline_mode = #tpu.pipeline_mode<synchronous>, transform_indices = @transform_2, window_bounds = array<i64: 1, 128>}, {pipeline_mode = #tpu.pipeline_mode<synchronous>, transform_indices = @transform_3, window_bounds = array<i64: 128, 128>}, {pipeline_mode = #tpu.pipeline_mode<synchronous>, transform_indices = @transform_4, window_bounds = array<i64: 1, 128>}, {transform_indices = @transform_5, window_bounds = array<i64: 8, 128>}]} {
    %c0 = arith.constant 0 : index
    %c0_0 = arith.constant 0 : index
    %0 = vector.load %arg1[%c0, %c0_0] : memref<8x16xf32, #tpu.memory_space<vmem>>, vector<8x16xf32>
    %c0_1 = arith.constant 0 : index
    %c0_2 = arith.constant 0 : index
    %1 = vector.load %arg2[%c0_1, %c0_2] : memref<16x128xf32, #tpu.memory_space<vmem>>, vector<16x128xf32>
    %cst = arith.constant dense<0.000000e+00> : vector<8x128xf32>
    %2 = tpu.matmul %0, %1, %cst {dimension_numbers = #tpu.dot_dimension_numbers<[1], [0], [0], [1], [0, 0, 1, 1], [], []>} : vector<8x16xf32>, vector<16x128xf32>, vector<8x128xf32> -> vector<8x128xf32>
    %c0_3 = arith.constant 0 : index
    %c0_4 = arith.constant 0 : index
    %3 = vector.load %arg3[%c0_3, %c0_4] : memref<1x128xf32, #tpu.memory_space<vmem>>, vector<1x128xf32>
    %4 = vector.broadcast %3 : vector<1x128xf32> to vector<8x128xf32>
    %5 = arith.addf %2, %4 : vector<8x128xf32>
    %cst_5 = arith.constant 0.000000e+00 : f32
    %6 = vector.broadcast %cst_5 : f32 to vector<8x128xf32>
    %7 = arith.maximumf %5, %6 : vector<8x128xf32>
    %c0_6 = arith.constant 0 : index
    %c0_7 = arith.constant 0 : index
    %8 = vector.load %arg4[%c0_6, %c0_7] : memref<128x128xf32, #tpu.memory_space<vmem>>, vector<128x128xf32>
    %cst_8 = arith.constant dense<0.000000e+00> : vector<8x128xf32>
    %9 = tpu.matmul %7, %8, %cst_8 {dimension_numbers = #tpu.dot_dimension_numbers<[1], [0], [0], [1], [0, 0, 1, 1], [], []>} : vector<8x128xf32>, vector<128x128xf32>, vector<8x128xf32> -> vector<8x128xf32>
    %c0_9 = arith.constant 0 : index
    %c0_10 = arith.constant 0 : index
    %10 = vector.load %arg5[%c0_9, %c0_10] : memref<1x128xf32, #tpu.memory_space<vmem>>, vector<1x128xf32>
    %11 = vector.broadcast %10 : vector<1x128xf32> to vector<8x128xf32>
    %12 = arith.addf %9, %11 : vector<8x128xf32>
    %cst_11 = arith.constant dense<0xFF800000> : vector<8xf32>
    %13 = vector.multi_reduction <maximumf>, %12, %cst_11 [1] : vector<8x128xf32> to vector<8xf32>
    %14 = vector.shape_cast %13 : vector<8xf32> to vector<8x1xf32>
    %15 = vector.broadcast %14 : vector<8x1xf32> to vector<8x128xf32>
    %16 = arith.subf %12, %15 : vector<8x128xf32>
    %17 = math.exp %16 : vector<8x128xf32>
    %cst_12 = arith.constant dense<0.000000e+00> : vector<8xf32>
    %18 = vector.multi_reduction <add>, %17, %cst_12 [1] : vector<8x128xf32> to vector<8xf32>
    %19 = vector.shape_cast %18 : vector<8xf32> to vector<8x1xf32>
    %20 = tpu.reciprocal %19 : vector<8x1xf32> -> vector<8x1xf32>
    %21 = vector.broadcast %20 : vector<8x1xf32> to vector<8x128xf32>
    %22 = arith.mulf %17, %21 : vector<8x128xf32>
    %c0_13 = arith.constant 0 : index
    %c0_14 = arith.constant 0 : index
    %23 = vector.load %arg6[%c0_13, %c0_14] : memref<8x128xf32, #tpu.memory_space<vmem>>, vector<8x128xf32>
    tpu.vector_store %arg6[%c0_13, %c0_14], %22 {strides = array<i32>} : memref<8x128xf32, #tpu.memory_space<vmem>>, vector<8x128xf32>,
    return
  }
  func.func @transform_0(%arg0: i32) -> (i32, i32) {
    %c0_i32 = arith.constant 0 : i32
    %c0_i32_0 = arith.constant 0 : i32
    return %arg0, %c0_i32 : i32, i32
  }
  func.func @transform_1(%arg0: i32) -> (i32, i32) {
    %c0_i32 = arith.constant 0 : i32
    %c0_i32_0 = arith.constant 0 : i32
    %c0_i32_1 = arith.constant 0 : i32
    return %c0_i32, %c0_i32_0 : i32, i32
  }
  func.func @transform_2(%arg0: i32) -> (i32, i32) {
    %c0_i32 = arith.constant 0 : i32
    %c0_i32_0 = arith.constant 0 : i32
    %c0_i32_1 = arith.constant 0 : i32
    return %c0_i32, %c0_i32_0 : i32, i32
  }
  func.func @transform_3(%arg0: i32) -> (i32, i32) {
    %c0_i32 = arith.constant 0 : i32
    %c0_i32_0 = arith.constant 0 : i32
    %c0_i32_1 = arith.constant 0 : i32
    return %c0_i32, %c0_i32_0 : i32, i32
  }
  func.func @transform_4(%arg0: i32) -> (i32, i32) {
    %c0_i32 = arith.constant 0 : i32
    %c0_i32_0 = arith.constant 0 : i32
    %c0_i32_1 = arith.constant 0 : i32
    return %c0_i32, %c0_i32_0 : i32, i32
  }
  func.func @transform_5(%arg0: i32) -> (i32, i32) {
    %c0_i32 = arith.constant 0 : i32
    %c0_i32_0 = arith.constant 0 : i32
    return %arg0, %c0_i32 : i32, i32
  }
}

</mosaic_0001>

<bundles_post_ra>
// kernel: tpu_custom_call.1
= control target key start
LH: loop header
LB: loop body
LE: loop exit
PB: predicated region body
PF: predicated region fallthrough
CT: control target
= control target key end

     0   :  { %10 = vsyncpa [#allocation3], 0  ;;  %s483_s0 = inlined_call_operand.hbm [shape: f32[8,16], index: 0, kind: input, shape index: {}]   ;;  %s484_s1 = inlined_call_operand.hbm [shape: f32[16,128], index: 1, kind: input, shape index: {}]   ;;  %s485_s2 = inlined_call_operand.vmem [shape: f32[1,128], index: 2, kind: input, shape index: {}]   ;;  %s486_s3 = inlined_call_operand.hbm [shape: f32[128,128], index: 3, kind: input, shape index: {}]   ;;  %s487_s4 = inlined_call_operand.vmem [shape: f32[1,128], index: 4, kind: input, shape index: {}]   ;;  %s488_s5 = inlined_call_operand.hbm [shape: f32[8,128], index: 5, kind: output, shape index: {}]  }
   0x1   :  { %11 = vsyncpa [#allocation6], 0 }
   0x2   :  { %12 = vsyncpa [#allocation4], 0  ;;  %s427_s18 = smov [#allocation5]  }
   0x3   :  { %s28_s19 = sshll.u32 %s427_s18, 4  ;;  %s29_s19 = int_to_ptr.vmem [resolvable:$true] %s28_s19 }
   0x4   :  { %s349_s20 = scalar_lea.vmem %s29_s19, 256  ;;  %p354_p1 = scmp.lt.s32.totalorder %s29_s19, %s29_s19 }
   0x5   :  { %p350_p0 = scmp.ne.s32.totalorder %s29_s19, %s349_s20  ;;  %p355_p2 = scmp.lt.s32.totalorder %s349_s20, %s349_s20 }
   0x7   :  { %p356_p3 = por %p355_p2, %p354_p1 }
   0x9   :  { %p357_p4 = pnand %p356_p3, %p350_p0 }
   0xb   :  { %360 = shalt.err (!%p357_p4)
}
   0xc   :  { %s428_s21 = smov 128   ;;  %s429_s22 = smov 8  }
   0xd   :  { %34 = dma.hbm_to_vmem [thread:$0]  %s484_s1, 256, %s29_s19, [#allocation6], %s428_s21, %s428_s21, %s429_s22  }
   0xe   :  { %s430_s25 = smov [#allocation2]   ;;  %s431_s27 = smov [#allocation7]  }
   0xf   :  { %s19_s26 = sshll.u32 %s430_s25, 4  ;;  %s42_s28 = sshll.u32 %s431_s27, 4  ;;  %s20_s26 = int_to_ptr.vmem [resolvable:$true] %s19_s26  ;;  %s43_s28 = int_to_ptr.vmem [resolvable:$true] %s42_s28 }
  0x10   :  { %s369_s29 = scalar_lea.vmem %s20_s26, 128  ;;  %p374_p6 = scmp.lt.s32.totalorder %s20_s26, %s20_s26 }
  0x11   :  { %p370_p5 = scmp.ne.s32.totalorder %s20_s26, %s369_s29  ;;  %p375_p7 = scmp.lt.s32.totalorder %s369_s29, %s369_s29 }
  0x13   :  { %p376_p8 = por %p375_p7, %p374_p6 }
  0x15   :  { %p377_p9 = pnand %p376_p8, %p370_p5 }
  0x17   :  { %380 = shalt.err (!%p377_p9)
}
  0x18   :  { %22 = dma.hbm_to_vmem [thread:$0]  %s483_s0, 128, %s20_s26, [#allocation3]  }
  0x19   :  { %s389_s7 = scalar_lea.vmem %s43_s28, 2048  ;;  %p394_p11 = scmp.lt.s32.totalorder %s43_s28, %s43_s28 }
  0x1a   :  { %p390_p10 = scmp.ne.s32.totalorder %s43_s28, %s389_s7  ;;  %p395_p12 = scmp.lt.s32.totalorder %s389_s7, %s389_s7 }
  0x1c   :  { %p396_p13 = por %p395_p12, %p394_p11 }
  0x1e   :  { %p397_p0 = pnand %p396_p13, %p390_p10 }
  0x20   :  { %400 = shalt.err (!%p397_p0)
}
  0x21   :  { %48 = dma.hbm_to_vmem [thread:$0]  %s486_s3, 2048, %s43_s28, [#allocation6], %s428_s21, %s428_s21, %s429_s22  }
  0x22   :  { %421 = dma.done.wait [#allocation3], 128  }
  0x23   :  { %422 = vsyncadd [#allocation3], 4294967168 }
  0x24   :  { %423 = dma.done.wait [#allocation6], 2304  }
  0x25   :  { %424 = vsyncadd [#allocation6], 4294964992  ;;  %v432_v0 = vmov 0.0   ;;  %vm433_vm0 = vmmov 0   ;;  %v62_v1 = vld [vmem:[#allocation5 + $0x8] sm:$0xff]  ;;  %v61_v2 = vld [vmem:[#allocation5] sm:$0xff] }
  0x26   :  { %287 = vmatprep.subr.mxu0 %v432_v0  ;;  %291 = vmatprep.mubr.msk.f32.mxu0 %vm433_vm0, %v432_v0  ;;  %v60_v3 = vld [vmem:[#allocation2] sm:$0xff]  ;;  %vm70_vm1 = vcmask 130048   ;;  %v160_v4 = vld [vmem:[#allocation7 + $0x78] sm:$0xff]  ;;  %v159_v5 = vld [vmem:[#allocation7 + $0x70] sm:$0xff] }
  0x27   :  { %294 = vmatprep.subr.mxu1 %v432_v0  ;;  %326 = vmatprep.mubr.msk.f32.mxu1 %vm433_vm0, %v432_v0  ;;  %v158_v6 = vld [vmem:[#allocation7 + $0x68] sm:$0xff]  ;;  %v157_v7 = vld [vmem:[#allocation7 + $0x60] sm:$0xff]  ;;  %v156_v8 = vld [vmem:[#allocation7 + $0x58] sm:$0xff] }
  0x28   :  { %288 = vmatpush3.msra.mxu0 %v62_v1  ;;  %295 = vmatpush3.msra.mxu1 %v160_v4  ;;  %v155_v9 = vld [vmem:[#allocation7 + $0x50] sm:$0xff]  ;;  %v154_v10 = vld [vmem:[#allocation7 + $0x48] sm:$0xff]  ;;  %v153_v11 = vld [vmem:[#allocation7 + $0x40] sm:$0xff] }
  0x29   :  { %289 = vmatprep.subr.mxu0 %v432_v0  ;;  %296 = vmatprep.subr.mxu1 %v432_v0  ;;  %v152_v12 = vld [vmem:[#allocation7 + $0x38] sm:$0xff]  ;;  %v151_v13 = vld [vmem:[#allocation7 + $0x30] sm:$0xff]  ;;  %v150_v14 = vld [vmem:[#allocation7 + $0x28] sm:$0xff] }
  0x2a   :  { %290 = vmatpush3.msra.mxu0 %v61_v2  ;;  %297 = vmatpush3.msra.mxu1 %v159_v5  ;;  %v149_v15 = vld [vmem:[#allocation7 + $0x20] sm:$0xff]  ;;  %v148_v16 = vld [vmem:[#allocation7 + $0x18] sm:$0xff]  ;;  %v147_v17 = vld [vmem:[#allocation7 + $0x10] sm:$0xff] }
  0x2b   :  { %292 = vmatmul.mubr.msk.f32.vlgmr.msra.gmra.mxu0 %vm70_vm1, %v60_v3  ;;  %298 = vmatprep.subr.mxu1 %v432_v0  ;;  %v146_v18 = vld [vmem:[#allocation7 + $0x8] sm:$0xff]  ;;  %v145_v19 = vld [vmem:[#allocation7] sm:$0xff] }
  0x2c   :  { %299 = vmatpush3.msra.mxu1 %v158_v6  ;;  %v264_v20 = vld [vmem:[%s485_s2] ss:$0 sm:$0xff]  ;;  %s434_s2 = smov [#allocation8]  }
  0x2d   :  { %300 = vmatprep.subr.mxu1 %v432_v0  ;;  %v266_v25 = vld [vmem:[%s487_s4] ss:$0 sm:$0xff]  ;;  %s254_s11 = sshll.u32 %s434_s2, 4  ;;  %s255_s11 = int_to_ptr.vmem [resolvable:$true] %s254_s11 }
  0x2e   :  { %301 = vmatpush3.msra.mxu1 %v157_v7  ;;  %s401_s12 = scalar_lea.vmem %s255_s11, 128  ;;  %p406_p2 = scmp.lt.s32.totalorder %s255_s11, %s255_s11 }
  0x2f   :  { %302 = vmatprep.subr.mxu1 %v432_v0  ;;  %p402_p1 = scmp.ne.s32.totalorder %s255_s11, %s401_s12  ;;  %p407_p3 = scmp.lt.s32.totalorder %s401_s12, %s401_s12 }
  0x30   :  { %303 = vmatpush3.msra.mxu1 %v156_v8 }
  0x31   :  { %304 = vmatprep.subr.mxu1 %v432_v0  ;;  %p408_p4 = por %p407_p3, %p406_p2 }
  0x32   :  { %305 = vmatpush3.msra.mxu1 %v155_v9 }
  0x33   :  { %306 = vmatprep.subr.mxu1 %v432_v0  ;;  %p409_p5 = pnand %p408_p4, %p402_p1 }
  0x34   :  { %307 = vmatpush3.msra.mxu1 %v154_v10 }
  0x35   :  { %308 = vmatprep.subr.mxu1 %v432_v0 }
  0x36   :  { %309 = vmatpush3.msra.mxu1 %v153_v11 }
  0x37   :  { %310 = vmatprep.subr.mxu1 %v432_v0 }
  0x38   :  { %311 = vmatpush3.msra.mxu1 %v152_v12 }
  0x39   :  { %312 = vmatprep.subr.mxu1 %v432_v0 }
  0x3a   :  { %313 = vmatpush3.msra.mxu1 %v151_v13 }
  0x3b   :  { %314 = vmatprep.subr.mxu1 %v432_v0 }
  0x3c   :  { %315 = vmatpush3.msra.mxu1 %v150_v14 }
  0x3d   :  { %316 = vmatprep.subr.mxu1 %v432_v0 }
  0x3e   :  { %317 = vmatpush3.msra.mxu1 %v149_v15 }
  0x3f   :  { %318 = vmatprep.subr.mxu1 %v432_v0 }
  0x40   :  { %319 = vmatpush3.msra.mxu1 %v148_v16 }
  0x41   :  { %320 = vmatprep.subr.mxu1 %v432_v0 }
  0x42   :  { %321 = vmatpush3.msra.mxu1 %v147_v17 }
  0x43   :  { %322 = vmatprep.subr.mxu1 %v432_v0 }
  0x44   :  { %323 = vmatpush3.msra.mxu1 %v146_v18 }
  0x45   :  { %324 = vmatprep.subr.mxu1 %v432_v0 }
  0x46   :  { %325 = vmatpush3.msra.mxu1 %v145_v19 }
  0xeb   :  { %v140_v21 = vpop.f32.mrf.mxu0 }
  0xec   :  { %v141_v22 = vadd.f32 %v264_v20, %v140_v21 }
  0xed   :  { %v293_v23 = vpop.f32.mrf.mxu0 }
  0xee   :  { %v144_v24 = vmax.f32 %v141_v22, 0.0 }
  0xf0   :  { %327 = vmatmul.mubr.f32.vlgmr.msra.gmra.mxu1 %v144_v24 }
 0x1b0   :  { %v234_v26 = vpop.f32.mrf.mxu1 }
 0x1b1   :  { %v235_v27 = vadd.f32 %v266_v25, %v234_v26 }
 0x1b2   :  { %v328_v28 = vpop.f32.mrf.mxu1 }
 0x1b3   :  { %238 = vmax.xlane.f32.xlu0 %v235_v27 }
 0x23c   :  { %v239_v29 = vpop.xlane.xlu0 %238 }
 0x23d   :  { %v240_v30 = vsub.f32 %v235_v27, %v239_v29 }
 0x23f   :  { %v241_v31 = vmul.f32 1.442695, %v240_v30 }
 0x241   :  { %337 = vpow2.f32 %v241_v31 }
 0x24e   :  { %v338_v32 = vpop.eup %337 }
 0x24f   :  { %243 = vadd.xlane.f32.xlu0 %v338_v32 }
 0x2d8   :  { %v244_v33 = vpop.xlane.xlu0 %243 }
 0x2d9   :  { %339 = vrcp.f32 %v244_v33 }
 0x2e6   :  { %v340_v34 = vpop.eup %339 }
 0x2e7   :  { %v246_v35 = vmul.f32 %v340_v34, %v338_v32 }
 0x2e9   :  { %247 = vst [vmem:[#allocation8] sm:$0xff] %v246_v35 }
 0x2ea   :  { %412 = shalt.err (!%p409_p5)
}
 0x2eb   :  { %257 = dma.vmem_to_hbm [thread:$0]  %s255_s11, 128, %s488_s5, [#allocation4]  }
 0x2ec   :  { %425 = dma.done.wait [#allocation4], 128  }
 0x2ed   :  { %426 = vsyncadd [#allocation4], 4294967168 }
 0x2ee   :  { %261 = vsyncpa [#allocation3], 1 }
 0x2ef   :  { %262 = vsyncpa [#allocation6], 1 }
 0x2f0   :  { %263 = vsyncpa [#allocation4], 1 }

</bundles_post_ra>
